<compile_context>
chip_gen: v7x
topology: tpu7x:2x2x1
jax: 0.10.0
libtpu: 0.0.40
codegen_flags: <defaults>
</compile_context>

<pallas_src>
import functools

import jax
import jax.numpy as jnp
import numpy as np
from jax.experimental import pallas as pl
from jax.experimental.pallas import tpu as pltpu


def _round_up(a, b):
    return -(-a // b) * b


def _recurrent_cycle_kernel(length, n_rows,
                            idx_ref,      # scalar prefetch (SMEM), (B_pad,) int32
                            data_ref,     # wrap-free tiled cycle data (VMEM-resident or HBM)
                            out_ref,      # VMEM output block, (n_rows, length, C)
                            copy_sems):   # DMA semaphores, (n_rows,)
    g = pl.program_id(0)

    # Issue one copy-engine DMA per batch row in this block.  All scalar (SMEM)
    # reads and all DMA starts happen before the first wait, so the copies
    # overlap each other and the pipeline's writeback of the previous block.
    copies = []
    for i in range(n_rows):
        c = idx_ref[g * n_rows + i]                     # window start row in [0, cycle_len)
        cp = pltpu.make_async_copy(
            data_ref.at[pl.ds(c, length), :],           # (length, C) wrap-free window
            out_ref.at[i],                              # straight into the output block
            copy_sems.at[i])
        cp.start()
        copies.append(cp)
    for cp in copies:
        cp.wait()


def _choose_batch_block(B, length, channels, itemsize):
    """Rows per grid step, sized from bytes (not a fixed divisor of B)."""
    c_pad = _round_up(channels, 128)                    # VMEM lane padding
    l_pad = _round_up(length, 8)                        # VMEM sublane padding
    row_vmem_bytes = l_pad * c_pad * itemsize           # one padded row in the out block
    row_bytes = max(length * channels * itemsize, 1)    # one logical (HBM) row

    out_block_budget = 8 << 20                          # double-buffered out block <= ~8 MiB
    max_rows_vmem = max(1, out_block_budget // (2 * row_vmem_bytes))
    target_rows = -(-(512 << 10) // row_bytes)          # >=512 KiB of output per step
    max_rows_unroll = 64                                # cap per-step DMA descriptors / unroll

    blk = max(1, min(B, max_rows_vmem, target_rows, max_rows_unroll))
    if B >= 2:                                          # keep >=2 grid steps (v7x: 2 TCs)
        blk = min(blk, -(-B // 2))
    return blk


def recurrent_cycle_forward(index, length, data):
    """Pallas equivalent of RecurrentCycle.forward(index, length)."""
    cycle_len, channels = data.shape
    B = index.shape[0]
    length = int(length)                                # static length required
    itemsize = jnp.dtype(data.dtype).itemsize

    # Floored mod: matches torch's `%`, safe for negative indices.
    idx = jnp.mod(index.astype(jnp.int32), jnp.int32(cycle_len))

    # Tile the cycle buffer so every window [c, c+length) with c in [0, cycle_len)
    # is contiguous (wrap-free).  Done once in XLA; the buffer is tiny.
    n_rep = -(-(cycle_len - 1 + length) // cycle_len)
    data_ext = jnp.tile(data, (n_rep, 1))               # (ext_rows, C)
    ext_rows = data_ext.shape[0]

    # Byte-sized batch block; pad B so every block is full.
    B_blk = _choose_batch_block(B, length, channels, itemsize)
    B_pad = _round_up(B, B_blk)
    if B_pad != B:
        idx = jnp.concatenate([idx, jnp.zeros((B_pad - B,), jnp.int32)])
    grid = (B_pad // B_blk,)

    kernel = functools.partial(_recurrent_cycle_kernel, length, B_blk)
    out_shape = jax.ShapeDtypeStruct((B_pad, length, channels), data.dtype)
    out_spec = pl.BlockSpec((B_blk, length, channels), lambda g, idx_ref: (g, 0, 0))
    scratch_shapes = [pltpu.SemaphoreType.DMA((B_blk,))]
    cparams = pltpu.CompilerParams(dimension_semantics=("parallel",))

    def build(data_spec):
        return pl.pallas_call(
            kernel,
            out_shape=out_shape,
            grid_spec=pltpu.PrefetchScalarGridSpec(
                num_scalar_prefetch=1,
                grid=grid,
                in_specs=[data_spec],
                out_specs=out_spec,
                scratch_shapes=scratch_shapes),
            compiler_params=cparams)

    try:
        # Fast path: full-shape VMEM BlockSpec with a constant index_map keeps the
        # cycle buffer resident in VMEM across all grid steps (single HBM read);
        # per-row gathers are local VMEM->VMEM copy-engine DMAs.
        vmem_spec = pl.BlockSpec((ext_rows, channels), lambda g, idx_ref: (0, 0))
        out = build(vmem_spec)(idx, data_ext)
    except Exception:
        # Portable path: gather each window directly from HBM (2x HBM read traffic,
        # but uses only the most widely supported dynamic-DMA slicing pattern).
        out = build(pl.BlockSpec(memory_space=pl.ANY))(idx, data_ext)

    return out[:B] if B_pad != B else out


def _reference(index, length, data):
    """Pure-JAX mirror of the PyTorch forward."""
    cycle_len = data.shape[0]
    gi = jnp.mod(index[:, None].astype(jnp.int32) + jnp.arange(length)[None, :],
                 cycle_len)
    return data[gi]


if __name__ == "__main__":
    # Small shapes consistent with the module: batch=2, length=16,
    # cycle_len=24, channel_size=4.
    B, length, cycle_len, channels = 2, 16, 24, 4

    key = jax.random.PRNGKey(0)
    k_data, k_idx = jax.random.split(key)

    # Random (non-zero) cycle data so the gather path is actually exercised
    # (the PyTorch parameter is initialized to zeros, which would hide bugs).
    data = 0.1 * jax.random.normal(k_data, (cycle_len, channels), jnp.float32)
    index = jax.random.randint(k_idx, (B,), 0, cycle_len, dtype=jnp.int32)

    out = recurrent_cycle_forward(index, length, data)
    out = jax.block_until_ready(out)

    ref = _reference(index, length, data)
    if np.allclose(np.asarray(out), np.asarray(ref), rtol=1e-6, atol=1e-6):
        print("KERNEL_OK")
    else:
        print("MISMATCH")
</pallas_src>

<mosaic_0001>
module attributes {stable_mosaic.version = 11 : i64} {
  func.func @_recurrent_cycle_kernel(%arg0: i32, %arg1: memref<2xi32, #tpu.memory_space<smem>>, %arg2: memref<48x4xf32, #tpu.memory_space<vmem>>, %arg3: memref<1x16x4xf32, #tpu.memory_space<vmem>>, %arg4: memref<1x!tpu.dma_semaphore, #tpu.memory_space<semaphore_mem>>) attributes {dimension_semantics = [#tpu.dimension_semantics<parallel>], iteration_bounds = array<i64: 2>, scalar_prefetch = 1 : i64, scratch_operands = 1 : i64, tpu.core_type = #tpu.core_type<tc>, window_params = [{pipeline_mode = #tpu.pipeline_mode<synchronous>, transform_indices = @transform_0, window_bounds = array<i64: 48, 4>}, {transform_indices = @transform_1, window_bounds = array<i64: 1, 16, 4>}]} {
    %c1_i32 = arith.constant 1 : i32
    %0 = arith.muli %arg0, %c1_i32 : i32
    %c0_i32 = arith.constant 0 : i32
    %1 = arith.addi %0, %c0_i32 : i32
    %2 = arith.index_cast %1 : i32 to index
    %3 = memref.load %arg1[%2] : memref<2xi32, #tpu.memory_space<smem>>
    %c0_i32_0 = arith.constant 0 : i32
    %c0_i32_1 = arith.constant 0 : i32
    %c0_i32_2 = arith.constant 0 : i32
    %4 = tpu.memref_slice %arg2[%3, %c0_i32_2] : memref<48x4xf32, #tpu.memory_space<vmem>> -> memref<16x4xf32, #tpu.memory_space<vmem>>
    %c0_i32_3 = arith.constant 0 : i32
    %c0_i32_4 = arith.constant 0 : i32
    %5 = tpu.memref_slice %arg3[%c0_i32_0, %c0_i32_3, %c0_i32_4] : memref<1x16x4xf32, #tpu.memory_space<vmem>> -> memref<1x16x4xf32, #tpu.memory_space<vmem>>
    %6 = tpu.memref_squeeze %5 : memref<1x16x4xf32, #tpu.memory_space<vmem>> -> memref<16x4xf32, #tpu.memory_space<vmem>>
    %7 = tpu.memref_slice %arg4[%c0_i32_1] : memref<1x!tpu.dma_semaphore, #tpu.memory_space<semaphore_mem>> -> memref<1x!tpu.dma_semaphore, #tpu.memory_space<semaphore_mem>>
    %8 = tpu.memref_squeeze %7 : memref<1x!tpu.dma_semaphore, #tpu.memory_space<semaphore_mem>> -> memref<!tpu.dma_semaphore, #tpu.memory_space<semaphore_mem>>
    tpu.enqueue_dma source(%4 : memref<16x4xf32, #tpu.memory_space<vmem>>) target(%6 : memref<16x4xf32, #tpu.memory_space<vmem>>) target_semaphore(%8 : memref<!tpu.dma_semaphore, #tpu.memory_space<semaphore_mem>>)
    %c0_i32_5 = arith.constant 0 : i32
    %c0_i32_6 = arith.constant 0 : i32
    %c0_i32_7 = arith.constant 0 : i32
    %9 = tpu.memref_slice %arg2[%3, %c0_i32_7] : memref<48x4xf32, #tpu.memory_space<vmem>> -> memref<16x4xf32, #tpu.memory_space<vmem>>
    %c0_i32_8 = arith.constant 0 : i32
    %c0_i32_9 = arith.constant 0 : i32
    %10 = tpu.memref_slice %arg3[%c0_i32_5, %c0_i32_8, %c0_i32_9] : memref<1x16x4xf32, #tpu.memory_space<vmem>> -> memref<1x16x4xf32, #tpu.memory_space<vmem>>
    %11 = tpu.memref_squeeze %10 : memref<1x16x4xf32, #tpu.memory_space<vmem>> -> memref<16x4xf32, #tpu.memory_space<vmem>>
    %12 = tpu.memref_slice %arg4[%c0_i32_6] : memref<1x!tpu.dma_semaphore, #tpu.memory_space<semaphore_mem>> -> memref<1x!tpu.dma_semaphore, #tpu.memory_space<semaphore_mem>>
    %13 = tpu.memref_squeeze %12 : memref<1x!tpu.dma_semaphore, #tpu.memory_space<semaphore_mem>> -> memref<!tpu.dma_semaphore, #tpu.memory_space<semaphore_mem>>
    tpu.wait_dma2 semaphore(%13 : memref<!tpu.dma_semaphore, #tpu.memory_space<semaphore_mem>>) src(%9 : memref<16x4xf32, #tpu.memory_space<vmem>>) dst(%11 : memref<16x4xf32, #tpu.memory_space<vmem>>)
    return
  }
  func.func @transform_0(%arg0: i32, %arg1: memref<2xi32, #tpu.memory_space<smem>>) -> (i32, i32) {
    %c0_i32 = arith.constant 0 : i32
    %c0_i32_0 = arith.constant 0 : i32
    %c0_i32_1 = arith.constant 0 : i32
    return %c0_i32, %c0_i32_0 : i32, i32
  }
  func.func @transform_1(%arg0: i32, %arg1: memref<2xi32, #tpu.memory_space<smem>>) -> (i32, i32, i32) {
    %c0_i32 = arith.constant 0 : i32
    %c0_i32_0 = arith.constant 0 : i32
    %c0_i32_1 = arith.constant 0 : i32
    return %arg0, %c0_i32, %c0_i32_0 : i32, i32, i32
  }
}

module attributes {stable_mosaic.version = 11 : i64} {
  func.func @_recurrent_cycle_kernel(%arg0: i32, %arg1: memref<2xi32, #tpu.memory_space<smem>>, %arg2: memref<48x4xf32, #tpu.memory_space<any>>, %arg3: memref<1x16x4xf32, #tpu.memory_space<vmem>>, %arg4: memref<1x!tpu.dma_semaphore, #tpu.memory_space<semaphore_mem>>) attributes {dimension_semantics = [#tpu.dimension_semantics<parallel>], iteration_bounds = array<i64: 2>, scalar_prefetch = 1 : i64, scratch_operands = 1 : i64, tpu.core_type = #tpu.core_type<tc>, window_params = [{}, {transform_indices = @transform_1, window_bounds = array<i64: 1, 16, 4>}]} {
    %c1_i32 = arith.constant 1 : i32
    %0 = arith.muli %arg0, %c1_i32 : i32
    %c0_i32 = arith.constant 0 : i32
    %1 = arith.addi %0, %c0_i32 : i32
    %2 = arith.index_cast %1 : i32 to index
    %3 = memref.load %arg1[%2] : memref<2xi32, #tpu.memory_space<smem>>
    %c0_i32_0 = arith.constant 0 : i32
    %c0_i32_1 = arith.constant 0 : i32
    %c0_i32_2 = arith.constant 0 : i32
    %4 = tpu.memref_slice %arg2[%3, %c0_i32_2] : memref<48x4xf32, #tpu.memory_space<any>> -> memref<16x4xf32, #tpu.memory_space<any>>
    %c0_i32_3 = arith.constant 0 : i32
    %c0_i32_4 = arith.constant 0 : i32
    %5 = tpu.memref_slice %arg3[%c0_i32_0, %c0_i32_3, %c0_i32_4] : memref<1x16x4xf32, #tpu.memory_space<vmem>> -> memref<1x16x4xf32, #tpu.memory_space<vmem>>
    %6 = tpu.memref_squeeze %5 : memref<1x16x4xf32, #tpu.memory_space<vmem>> -> memref<16x4xf32, #tpu.memory_space<vmem>>
    %7 = tpu.memref_slice %arg4[%c0_i32_1] : memref<1x!tpu.dma_semaphore, #tpu.memory_space<semaphore_mem>> -> memref<1x!tpu.dma_semaphore, #tpu.memory_space<semaphore_mem>>
    %8 = tpu.memref_squeeze %7 : memref<1x!tpu.dma_semaphore, #tpu.memory_space<semaphore_mem>> -> memref<!tpu.dma_semaphore, #tpu.memory_space<semaphore_mem>>
    tpu.enqueue_dma source(%4 : memref<16x4xf32, #tpu.memory_space<any>>) target(%6 : memref<16x4xf32, #tpu.memory_space<vmem>>) target_semaphore(%8 : memref<!tpu.dma_semaphore, #tpu.memory_space<semaphore_mem>>)
    %c0_i32_5 = arith.constant 0 : i32
    %c0_i32_6 = arith.constant 0 : i32
    %c0_i32_7 = arith.constant 0 : i32
    %9 = tpu.memref_slice %arg2[%3, %c0_i32_7] : memref<48x4xf32, #tpu.memory_space<any>> -> memref<16x4xf32, #tpu.memory_space<any>>
    %c0_i32_8 = arith.constant 0 : i32
    %c0_i32_9 = arith.constant 0 : i32
    %10 = tpu.memref_slice %arg3[%c0_i32_5, %c0_i32_8, %c0_i32_9] : memref<1x16x4xf32, #tpu.memory_space<vmem>> -> memref<1x16x4xf32, #tpu.memory_space<vmem>>
    %11 = tpu.memref_squeeze %10 : memref<1x16x4xf32, #tpu.memory_space<vmem>> -> memref<16x4xf32, #tpu.memory_space<vmem>>
    %12 = tpu.memref_slice %arg4[%c0_i32_6] : memref<1x!tpu.dma_semaphore, #tpu.memory_space<semaphore_mem>> -> memref<1x!tpu.dma_semaphore, #tpu.memory_space<semaphore_mem>>
    %13 = tpu.memref_squeeze %12 : memref<1x!tpu.dma_semaphore, #tpu.memory_space<semaphore_mem>> -> memref<!tpu.dma_semaphore, #tpu.memory_space<semaphore_mem>>
    tpu.wait_dma2 semaphore(%13 : memref<!tpu.dma_semaphore, #tpu.memory_space<semaphore_mem>>) src(%9 : memref<16x4xf32, #tpu.memory_space<any>>) dst(%11 : memref<16x4xf32, #tpu.memory_space<vmem>>)
    return
  }
  func.func @transform_1(%arg0: i32, %arg1: memref<2xi32, #tpu.memory_space<smem>>) -> (i32, i32, i32) {
    %c0_i32 = arith.constant 0 : i32
    %c0_i32_0 = arith.constant 0 : i32
    %c0_i32_1 = arith.constant 0 : i32
    return %arg0, %c0_i32, %c0_i32_0 : i32, i32, i32
  }
}

</mosaic_0001>

<bundles_post_ra>
// kernel: tpu_custom_call.1
= control target key start
LH: loop header
LB: loop body
LE: loop exit
PB: predicated region body
PF: predicated region fallthrough
CT: control target
= control target key end

     0   :  { %s279_s0 = inlined_call_operand.vmem [shape: s32[2], index: 0, kind: input, shape index: {}]   ;;  %s280_s1 = inlined_call_operand.vmem [shape: f32[48,4], index: 1, kind: input, shape index: {}]   ;;  %s281_s2 = inlined_call_operand.vmem [shape: f32[2,16,4], index: 2, kind: output, shape index: {}]  }
   0x1   :  { %s7_s11 = sshll.u32 %s279_s0, 4  ;;  %s8_s11 = int_to_ptr.vmem [resolvable:$true] %s7_s11 }
   0x2   :  { %s230_s12 = scalar_lea.vmem %s8_s11, 16  ;;  %p235_p1 = scmp.lt.s32.totalorder %s8_s11, %s8_s11 }
   0x3   :  { %p231_p0 = scmp.ne.s32.totalorder %s8_s11, %s230_s12  ;;  %p236_p2 = scmp.lt.s32.totalorder %s230_s12, %s230_s12 }
   0x5   :  { %p237_p3 = por %p236_p2, %p235_p1 }
   0x7   :  { %p238_p4 = pnand %p237_p3, %p231_p0 }
   0x9   :  { %241 = shalt.err (!%p238_p4)  }
   0xa   :  { %s254_s13 = smov [#allocation4]  }
   0xb   :  { %10 = dma.vmem_to_smem %s8_s11, 16, %s254_s13, [#allocation3] }
   0xc   :  { %246 = dma.done.wait [#allocation3], 16 }
   0xd   :  { %247 = vsyncadd [#allocation3], 4294967280 }
   0xe   :  { %12 = sfence }
   0xf   :  { %s250_s14 = smov 0  }
  0x10 LB: > { %s211_s15 = sadd.s32 4294967295, %s252_s14   ;;  %p214_p5 = scmp.ge.s32.totalorder %s252_s14, 1  ;;  %s252_s14 = sphi %s250_s14, %s18_s14  }
  0x11   : > { %p84_p6 = scmp.lt.s32.totalorder %s252_s14, 3 }
  0x13   : > { %p85_p7 = pnand %p214_p5, %p84_p6 }
  0x14   : > { %p99_p8 = scmp.lt.s32.totalorder (!%p85_p7), %s211_s15, 1  ;;  %s104_s0 = sld [smem:[#allocation4 + %s211_s15]] (!%p85_p7) }
  0x15   : > { %88 = sbr.rel (%p85_p7) target bundleno = 35 (0x23), region = 24 }
  0x1a   : > { %s105_s22 = scalar_lea.vmem (!%p85_p7), %s280_s1, %s104_s0 }
  0x1b   : > { %v138_v0 = vld [vmem:[%s105_s22] sm:$0xff] (!%p85_p7)  ;;  %v140_v1 = vld [vmem:[%s105_s22 + $0x8] sm:$0xff] (!%p85_p7) }
  0x1c   : > { %s283_s15 = smov (!%p99_p8, %s211_s15), 1 }
  0x1d   : > { %s220_s16 = sshll.u32 %s283_s15, 4 }
  0x1e   : > { %s103_s19 = scalar_lea.vmem %s281_s2, %s220_s16 }
  0x1f   : > { %139 = vst [vmem:[%s103_s19] sm:$0xff] %v138_v0  ;;  %141 = vst [vmem:[%s103_s19 + $0x8] sm:$0xff] %v140_v1 }
  0x20   : > { %149 = vsyncadd [#allocation2], 256 }
  0x21   : > { %248 = dma.done.wait [#allocation2], 256 }
  0x22   : > { %249 = vsyncadd [#allocation2], 4294967040 }
  0x23 PF: > { %s18_s14 = sadd.s32 1, %s252_s14  }
  0x24   : > { %p15_p9 = scmp.ge.s32.totalorder %s18_s14, 4  }
  0x26   :  { %17 = sbr.rel (!%p15_p9) target bundleno = 16 (0x10), region = 94 }
  0x2d   :  { %174 = vsyncmov [#allocation2] }
  0x30   :  { %s175_s23 = vpop.sfrf %174 }
  0x31   :  { %p219_p10 = scmp.ne.s32.totalorder %s175_s23, 0 }
  0x33   :  { %179 = shalt.err (%p219_p10)  }

// kernel: tpu_custom_call.1
= control target key start
LH: loop header
LB: loop body
LE: loop exit
PB: predicated region body
PF: predicated region fallthrough
CT: control target
= control target key end

     0   :  { %s226_s0 = inlined_call_operand.vmem [shape: s32[2], index: 0, kind: input, shape index: {}]   ;;  %s227_s1 = inlined_call_operand.vmem [shape: f32[48,4], index: 1, kind: input, shape index: {}]   ;;  %s228_s2 = inlined_call_operand.vmem [shape: f32[2,16,4], index: 2, kind: output, shape index: {}]  }
   0x1   :  { %s7_s11 = sshll.u32 %s226_s0, 4  ;;  %s8_s11 = int_to_ptr.vmem [resolvable:$true] %s7_s11 }
   0x2   :  { %s177_s12 = scalar_lea.vmem %s8_s11, 16  ;;  %p182_p1 = scmp.lt.s32.totalorder %s8_s11, %s8_s11 }
   0x3   :  { %p178_p0 = scmp.ne.s32.totalorder %s8_s11, %s177_s12  ;;  %p183_p2 = scmp.lt.s32.totalorder %s177_s12, %s177_s12 }
   0x5   :  { %p184_p3 = por %p183_p2, %p182_p1 }
   0x7   :  { %p185_p4 = pnand %p184_p3, %p178_p0 }
   0x9   :  { %188 = shalt.err (!%p185_p4)  }
   0xa   :  { %s201_s13 = smov [#allocation4]  }
   0xb   :  { %10 = dma.vmem_to_smem %s8_s11, 16, %s201_s13, [#allocation3] }
   0xc   :  { %193 = dma.done.wait [#allocation3], 16 }
   0xd   :  { %194 = vsyncadd [#allocation3], 4294967280 }
   0xe   :  { %12 = sfence }
   0xf   :  { %s197_s14 = smov 0  }
  0x10 LB: > { %p161_p5 = scmp.ge.s32.totalorder %s199_s14, 2  ;;  %s199_s14 = sphi %s197_s14, %s18_s14  }
  0x11   : > { %p51_p6 = scmp.lt.s32.totalorder (!%p161_p5), %s199_s14, 1  ;;  %s56_s0 = sld [smem:[#allocation4 + %s199_s14]] (!%p161_p5) }
  0x12   : > { %43 = sbr.rel (%p161_p5) target bundleno = 33 (0x21), region = 12 }
  0x17   : > { %s57_s22 = scalar_lea.vmem (!%p161_p5), %s227_s1, %s56_s0 }
  0x18   : > { %v90_v0 = vld [vmem:[%s57_s22] sm:$0xff] (!%p161_p5)  ;;  %v92_v1 = vld [vmem:[%s57_s22 + $0x8] sm:$0xff] (!%p161_p5) }
  0x19   : > { %s52_s15 = scalar_select %p51_p6, %s199_s14, 1 }
  0x1b   : > { %s167_s16 = sshll.u32 %s52_s15, 4 }
  0x1c   : > { %s55_s19 = scalar_lea.vmem %s228_s2, %s167_s16 }
  0x1d   : > { %91 = vst [vmem:[%s55_s19] sm:$0xff] %v90_v0  ;;  %93 = vst [vmem:[%s55_s19 + $0x8] sm:$0xff] %v92_v1 }
  0x1e   : > { %101 = vsyncadd [#allocation2], 256 }
  0x1f   : > { %195 = dma.done.wait [#allocation2], 256 }
  0x20   : > { %196 = vsyncadd [#allocation2], 4294967040 }
  0x21 PF: > { %s18_s14 = sadd.s32 1, %s199_s14  }
  0x22   : > { %p15_p7 = scmp.ge.s32.totalorder %s18_s14, 3  }
  0x24   :  { %17 = sbr.rel (!%p15_p7) target bundleno = 16 (0x10), region = 82 }
  0x2b   :  { %126 = vsyncmov [#allocation2] }
  0x2e   :  { %s127_s23 = vpop.sfrf %126 }
  0x2f   :  { %p166_p8 = scmp.ne.s32.totalorder %s127_s23, 0 }
  0x31   :  { %131 = shalt.err (%p166_p8)  }

</bundles_post_ra>
